<compile_context>
chip_gen: v5e
topology: v5e:2x2
jax: 0.10.0
libtpu: 0.0.40
codegen_flags: <defaults>
</compile_context>

<pallas_src>
import jax
import jax.numpy as jnp
from jax import lax
from jax.experimental import pallas as pl
from jax.experimental.pallas import tpu as pltpu


def mlp_kernel(x_ref, w1_ref, b1_ref, w2_ref, b2_ref, w3_ref, b3_ref, o_ref):
    # Feature-major compute with batch on the lane axis, with no explicit
    # transpose: contract over x's minor (feature) dim directly.
    # w1 [64, F] (bf16) x x [TB, F] (bf16) -> h1 [64, TB] (f32 accumulator).
    h1 = lax.dot_general(
        w1_ref[...], x_ref[...],
        dimension_numbers=(((1,), (1,)), ((), ())),
        preferred_element_type=jnp.float32,
    )
    h1 = jnp.maximum(h1 + b1_ref[...], 0.0)                             # ReLU
    h2 = jnp.dot(w2_ref[...], h1, preferred_element_type=jnp.float32)   # [32, TB]
    h2 = jnp.maximum(h2 + b2_ref[...], 0.0)                             # ReLU
    # Final 32 -> 1 layer: VPU multiply + sublane-sum (no 1-row MXU matmul).
    o_ref[...] = jnp.sum(h2 * w3_ref[...], axis=0, keepdims=True) + b3_ref[...]


def _round_up(n, m):
    return ((n + m - 1) // m) * m


def _cdiv(a, b):
    return -(-a // b)


def _device_defaults():
    """(tile_b, vmem_limit_bytes, tensorcores_per_chip) for the local TPU."""
    kind = ""
    try:
        kind = jax.devices()[0].device_kind.lower()
    except Exception:
        pass
    if "v7" in kind or "7x" in kind:
        # 64 MiB VMEM per TensorCore, 2 TCs/chip: smaller tile, >=2 grid steps.
        return 8192, 40 * 1024 * 1024, 2
    if "v6" in kind:
        return 16384, 64 * 1024 * 1024, 1
    if "v5" in kind:
        # Default scoped VMEM is only 16 MiB on v5e; raise it for the big tile.
        return 16384, 96 * 1024 * 1024, 1
    # Unknown chip: conservative tile, leave the scoped-VMEM limit alone.
    return 4096, None, 1


def mlp_regressor_forward(x, params, tile_b=None):
    """Forward pass of MLPRegressor. x: [B, F] float32 -> [B, 1] float32."""
    w1, b1, w2, b2, w3, b3 = params
    B, F = x.shape
    H1 = w1.shape[0]  # 64
    H2 = w2.shape[0]  # 32

    default_tb, vmem_limit, n_cores = _device_defaults()
    if tile_b is None:
        tile_b = default_tb

    # Batch tile: at least 128 rows (full lanes), capped at the per-chip tile.
    tb = min(tile_b, _round_up(max(B, 1), 128))
    # Give the second TensorCore (v7x) something to do: >= 2 grid steps.
    if n_cores > 1 and B > 256 and _cdiv(B, tb) < 2:
        tb = _round_up(_cdiv(B, 2), 128)
    grid = _cdiv(B, tb)

    # Stream x and W1 as bf16 (f32 accumulation inside the kernel).
    x_in = x.astype(jnp.bfloat16)
    w1_in = w1.astype(jnp.bfloat16)

    if B < tb:
        # Tiny batch: cheap pad up to one full tile. Large ragged batches use
        # Pallas partial boundary blocks instead (no extra HBM pass over x);
        # the unspecified tail columns are sliced off below.
        x_in = jnp.pad(x_in, ((0, tb - B), (0, 0)))

    # Biases (and the final-layer weight) become columns so they broadcast
    # over the lane/batch dimension inside the kernel.
    b1c = b1.reshape(H1, 1)
    b2c = b2.reshape(H2, 1)
    w3c = w3.reshape(H2, 1)   # nn.Linear(32, 1): weight is [1, 32]
    b3c = b3.reshape(1, 1)

    const = lambda i: (0, 0)  # weights/biases resident across the whole grid

    compiler_kwargs = dict(dimension_semantics=("parallel",))
    if vmem_limit is not None:
        compiler_kwargs["vmem_limit_bytes"] = vmem_limit

    out_row = pl.pallas_call(
        mlp_kernel,
        out_shape=jax.ShapeDtypeStruct((1, grid * tb), jnp.float32),
        grid=(grid,),
        in_specs=[
            pl.BlockSpec((tb, F), lambda i: (i, 0)),  # x tile (streamed, bf16)
            pl.BlockSpec((H1, F), const),             # W1 (resident, bf16)
            pl.BlockSpec((H1, 1), const),             # b1
            pl.BlockSpec((H2, H1), const),            # W2
            pl.BlockSpec((H2, 1), const),             # b2
            pl.BlockSpec((H2, 1), const),             # w3 column
            pl.BlockSpec((1, 1), const),              # b3
        ],
        out_specs=pl.BlockSpec((1, tb), lambda i: (0, i)),  # lane-dense output
        compiler_params=pltpu.CompilerParams(**compiler_kwargs),
    )(x_in, w1_in, b1c, w2, b2c, w3c, b3c)

    return out_row[0, :B].reshape(B, 1)


def init_params(input_size, key):
    """Deterministic init matching nn.Linear (U[-1/sqrt(fan_in), 1/sqrt(fan_in)])."""
    keys = jax.random.split(key, 6)

    def linear(kw, kb, fan_in, fan_out):
        bound = 1.0 / jnp.sqrt(jnp.float32(fan_in))
        w = jax.random.uniform(kw, (fan_out, fan_in), jnp.float32, -bound, bound)
        b = jax.random.uniform(kb, (fan_out,), jnp.float32, -bound, bound)
        return w, b

    w1, b1 = linear(keys[0], keys[1], input_size, 64)
    w2, b2 = linear(keys[2], keys[3], 64, 32)
    w3, b3 = linear(keys[4], keys[5], 32, 1)
    return (w1, b1, w2, b2, w3, b3)


if __name__ == "__main__":
    key = jax.random.PRNGKey(0)
    k_x, k_p = jax.random.split(key)

    batch = 8
    input_size = 16  # stands in for X_test.shape[1]

    x = jax.random.normal(k_x, (batch, input_size), dtype=jnp.float32)
    params = init_params(input_size, k_p)

    out = mlp_regressor_forward(x, params)
    out = jax.block_until_ready(out)

    # Pure-JAX f32 reference of the same forward pass. The kernel streams
    # x / W1 in bf16, so the tolerance is loosened accordingly.
    w1, b1, w2, b2, w3, b3 = params
    ref = jnp.maximum(x @ w1.T + b1, 0.0)
    ref = jnp.maximum(ref @ w2.T + b2, 0.0)
    ref = ref @ w3.T + b3

    assert out.shape == (batch, 1)
    max_err = float(jnp.max(jnp.abs(out - ref)))
    assert jnp.allclose(out, ref, atol=2e-2, rtol=2e-2), max_err

    print("KERNEL_OK")
</pallas_src>

<mosaic_0001>
module attributes {stable_mosaic.version = 11 : i64} {
  func.func @mlp_kernel(%arg0: i32, %arg1: memref<128x16xbf16, #tpu.memory_space<vmem>>, %arg2: memref<64x16xbf16, #tpu.memory_space<vmem>>, %arg3: memref<64x1xf32, #tpu.memory_space<vmem>>, %arg4: memref<32x64xf32, #tpu.memory_space<vmem>>, %arg5: memref<32x1xf32, #tpu.memory_space<vmem>>, %arg6: memref<32x1xf32, #tpu.memory_space<vmem>>, %arg7: memref<1x1xf32, #tpu.memory_space<vmem>>, %arg8: memref<1x128xf32, #tpu.memory_space<vmem>>) attributes {dimension_semantics = [#tpu.dimension_semantics<parallel>], iteration_bounds = array<i64: 1>, scalar_prefetch = 0 : i64, scratch_operands = 0 : i64, tpu.core_type = #tpu.core_type<tc>, window_params = [{transform_indices = @transform_0, window_bounds = array<i64: 128, 16>}, {pipeline_mode = #tpu.pipeline_mode<synchronous>, transform_indices = @transform_1, window_bounds = array<i64: 64, 16>}, {pipeline_mode = #tpu.pipeline_mode<synchronous>, transform_indices = @transform_2, window_bounds = array<i64: 64, 1>}, {pipeline_mode = #tpu.pipeline_mode<synchronous>, transform_indices = @transform_3, window_bounds = array<i64: 32, 64>}, {pipeline_mode = #tpu.pipeline_mode<synchronous>, transform_indices = @transform_4, window_bounds = array<i64: 32, 1>}, {pipeline_mode = #tpu.pipeline_mode<synchronous>, transform_indices = @transform_5, window_bounds = array<i64: 32, 1>}, {pipeline_mode = #tpu.pipeline_mode<synchronous>, transform_indices = @transform_6, window_bounds = array<i64: 1, 1>}, {transform_indices = @transform_7, window_bounds = array<i64: 1, 128>}]} {
    %c0 = arith.constant 0 : index
    %c0_0 = arith.constant 0 : index
    %0 = vector.load %arg2[%c0, %c0_0] : memref<64x16xbf16, #tpu.memory_space<vmem>>, vector<64x16xbf16>
    %c0_1 = arith.constant 0 : index
    %c0_2 = arith.constant 0 : index
    %1 = vector.load %arg1[%c0_1, %c0_2] : memref<128x16xbf16, #tpu.memory_space<vmem>>, vector<128x16xbf16>
    %cst = arith.constant dense<0.000000e+00> : vector<64x128xf32>
    %2 = tpu.matmul %0, %1, %cst {dimension_numbers = #tpu.dot_dimension_numbers<[1], [1], [0], [0], [0, 0, 1, 0], [], []>} : vector<64x16xbf16>, vector<128x16xbf16>, vector<64x128xf32> -> vector<64x128xf32>
    %c0_3 = arith.constant 0 : index
    %c0_4 = arith.constant 0 : index
    %3 = vector.load %arg3[%c0_3, %c0_4] : memref<64x1xf32, #tpu.memory_space<vmem>>, vector<64x1xf32>
    %4 = vector.broadcast %3 : vector<64x1xf32> to vector<64x128xf32>
    %5 = arith.addf %2, %4 : vector<64x128xf32>
    %cst_5 = arith.constant 0.000000e+00 : f32
    %6 = vector.broadcast %cst_5 : f32 to vector<64x128xf32>
    %7 = arith.maximumf %5, %6 : vector<64x128xf32>
    %c0_6 = arith.constant 0 : index
    %c0_7 = arith.constant 0 : index
    %8 = vector.load %arg4[%c0_6, %c0_7] : memref<32x64xf32, #tpu.memory_space<vmem>>, vector<32x64xf32>
    %cst_8 = arith.constant dense<0.000000e+00> : vector<32x128xf32>
    %9 = tpu.matmul %8, %7, %cst_8 {dimension_numbers = #tpu.dot_dimension_numbers<[1], [0], [0], [1], [0, 0, 1, 1], [], []>} : vector<32x64xf32>, vector<64x128xf32>, vector<32x128xf32> -> vector<32x128xf32>
    %c0_9 = arith.constant 0 : index
    %c0_10 = arith.constant 0 : index
    %10 = vector.load %arg5[%c0_9, %c0_10] : memref<32x1xf32, #tpu.memory_space<vmem>>, vector<32x1xf32>
    %11 = vector.broadcast %10 : vector<32x1xf32> to vector<32x128xf32>
    %12 = arith.addf %9, %11 : vector<32x128xf32>
    %cst_11 = arith.constant 0.000000e+00 : f32
    %13 = vector.broadcast %cst_11 : f32 to vector<32x128xf32>
    %14 = arith.maximumf %12, %13 : vector<32x128xf32>
    %c0_12 = arith.constant 0 : index
    %c0_13 = arith.constant 0 : index
    %15 = vector.load %arg6[%c0_12, %c0_13] : memref<32x1xf32, #tpu.memory_space<vmem>>, vector<32x1xf32>
    %16 = vector.broadcast %15 : vector<32x1xf32> to vector<32x128xf32>
    %17 = arith.mulf %14, %16 : vector<32x128xf32>
    %cst_14 = arith.constant dense<0.000000e+00> : vector<128xf32>
    %18 = vector.multi_reduction <add>, %17, %cst_14 [0] : vector<32x128xf32> to vector<128xf32>
    %19 = vector.shape_cast %18 : vector<128xf32> to vector<1x128xf32>
    %c0_15 = arith.constant 0 : index
    %c0_16 = arith.constant 0 : index
    %20 = vector.load %arg7[%c0_15, %c0_16] : memref<1x1xf32, #tpu.memory_space<vmem>>, vector<1x1xf32>
    %21 = vector.broadcast %20 : vector<1x1xf32> to vector<1x128xf32>
    %22 = arith.addf %19, %21 : vector<1x128xf32>
    %c0_17 = arith.constant 0 : index
    %c0_18 = arith.constant 0 : index
    %23 = vector.load %arg8[%c0_17, %c0_18] : memref<1x128xf32, #tpu.memory_space<vmem>>, vector<1x128xf32>
    tpu.vector_store %arg8[%c0_17, %c0_18], %22 {strides = array<i32>} : memref<1x128xf32, #tpu.memory_space<vmem>>, vector<1x128xf32>,
    return
  }
  func.func @transform_0(%arg0: i32) -> (i32, i32) {
    %c0_i32 = arith.constant 0 : i32
    %c0_i32_0 = arith.constant 0 : i32
    return %arg0, %c0_i32 : i32, i32
  }
  func.func @transform_1(%arg0: i32) -> (i32, i32) {
    %c0_i32 = arith.constant 0 : i32
    %c0_i32_0 = arith.constant 0 : i32
    %c0_i32_1 = arith.constant 0 : i32
    return %c0_i32, %c0_i32_0 : i32, i32
  }
  func.func @transform_2(%arg0: i32) -> (i32, i32) {
    %c0_i32 = arith.constant 0 : i32
    %c0_i32_0 = arith.constant 0 : i32
    %c0_i32_1 = arith.constant 0 : i32
    return %c0_i32, %c0_i32_0 : i32, i32
  }
  func.func @transform_3(%arg0: i32) -> (i32, i32) {
    %c0_i32 = arith.constant 0 : i32
    %c0_i32_0 = arith.constant 0 : i32
    %c0_i32_1 = arith.constant 0 : i32
    return %c0_i32, %c0_i32_0 : i32, i32
  }
  func.func @transform_4(%arg0: i32) -> (i32, i32) {
    %c0_i32 = arith.constant 0 : i32
    %c0_i32_0 = arith.constant 0 : i32
    %c0_i32_1 = arith.constant 0 : i32
    return %c0_i32, %c0_i32_0 : i32, i32
  }
  func.func @transform_5(%arg0: i32) -> (i32, i32) {
    %c0_i32 = arith.constant 0 : i32
    %c0_i32_0 = arith.constant 0 : i32
    %c0_i32_1 = arith.constant 0 : i32
    return %c0_i32, %c0_i32_0 : i32, i32
  }
  func.func @transform_6(%arg0: i32) -> (i32, i32) {
    %c0_i32 = arith.constant 0 : i32
    %c0_i32_0 = arith.constant 0 : i32
    %c0_i32_1 = arith.constant 0 : i32
    return %c0_i32, %c0_i32_0 : i32, i32
  }
  func.func @transform_7(%arg0: i32) -> (i32, i32) {
    %c0_i32 = arith.constant 0 : i32
    %c0_i32_0 = arith.constant 0 : i32
    return %c0_i32, %arg0 : i32, i32
  }
}

</mosaic_0001>

<bundles_post_ra>
// kernel: tpu_custom_call.1
= control target key start
LH: loop header
LB: loop body
LE: loop exit
PB: predicated region body
PF: predicated region fallthrough
CT: control target
= control target key end

     0   :  { %s642_s0 = inlined_call_operand.vmem [shape: bf16[128,16], index: 0, kind: input, shape index: {}]   ;;  %s643_s1 = inlined_call_operand.vmem [shape: bf16[64,16], index: 1, kind: input, shape index: {}]   ;;  %s644_s2 = inlined_call_operand.vmem [shape: f32[64,1], index: 2, kind: input, shape index: {}]   ;;  %s645_s3 = inlined_call_operand.vmem [shape: f32[32,64], index: 3, kind: input, shape index: {}]   ;;  %s646_s4 = inlined_call_operand.vmem [shape: f32[32,1], index: 4, kind: input, shape index: {}]   ;;  %s647_s5 = inlined_call_operand.vmem [shape: f32[32,1], index: 5, kind: input, shape index: {}]   ;;  %s648_s6 = inlined_call_operand.<no memory space> [shape: f32[1,1], index: 6, kind: input, shape index: {}]   ;;  %s649_s7 = inlined_call_operand.hbm [shape: f32[1,128], index: 7, kind: output, shape index: {}]  }
   0x1   :  { %v12_v0 = vstv %s648_s6 }
   0x2   :  { %13 = vst [vmem:[#allocation2] sm:$0x1] %v12_v0 }
   0x3   :  { %v438_v1 = vld [vmem:[%s642_s0 + $0x38] sm:$0xff]  ;;  %vm161_vm0 = vcmask 130048  }
   0x4   :  { %14 = vsyncpa [#allocation4], 0  ;;  %v196_v2 = vsel %vm161_vm0, %v438_v1, 0  ;;  %v437_v3 = vld [vmem:[%s642_s0 + $0x30] sm:$0xff]  ;;  %v436_v5 = vld [vmem:[%s642_s0 + $0x28] sm:$0xff]  ;;  %v486_v12 = vmov 0  }
   0x5   :  { %440 = vmatpush.bf16.xpose.msra.mxu3 %v196_v2  ;;  %198 = vmatpush.bf16.xpose.msra.mxu0 %v196_v2  ;;  %v193_v4 = vsel %vm161_vm0, %v437_v3, 0  ;;  %v190_v6 = vsel %vm161_vm0, %v436_v5, 0  ;;  %v435_v7 = vld [vmem:[%s642_s0 + $0x20] sm:$0xff]  ;;  %v60_v9 = vld [vmem:[%s644_s2 + $0x38] sm:$0xff]  ;;  %v58_v10 = vld [vmem:[%s644_s2 + $0x28] sm:$0xff]  ;;  %vm263_vm1 = vcmask 523264  }
   0x6   :  { %439 = vmatpush.bf16.xpose.msra.mxu2 %v196_v2  ;;  %v187_v8 = vsel %vm161_vm0, %v435_v7, 0  ;;  %v434_v11 = vld [vmem:[%s642_s0 + $0x18] sm:$0xff]  ;;  %457 = vset.pattern.permute.xlu0 %v486_v12  ;;  %v59_v14 = vld [vmem:[%s644_s2 + $0x30] sm:$0xff]  ;;  %v57_v15 = vld [vmem:[%s644_s2 + $0x20] sm:$0xff]  ;;  %s362_s16 = sshll.u32 %s649_s7, 4  ;;  %s363_s16 = int_to_ptr.hbm [resolvable:$true] %s362_s16 }
   0x7   :  { %98 = vperm.xlu0 %457, %v60_v9   ;;  %458 = vset.pattern.permute.xlu1 %v486_v12  ;;  %v184_v13 = vsel %vm161_vm0, %v434_v11, 0  ;;  %v433_v16 = vld [vmem:[%s642_s0 + $0x10] sm:$0xff]  ;;  %v54_v18 = vld [vmem:[%s644_s2 + $0x8] sm:$0xff]  ;;  %v53_v19 = vld [vmem:[%s644_s2] sm:$0xff] }
   0x8   :  { %88 = vperm.xlu1 %458, %v58_v10   ;;  %459 = vset.pattern.permute.xlu2 %v486_v12  ;;  %v181_v17 = vsel %vm161_vm0, %v433_v16, 0  ;;  %v432_v20 = vld [vmem:[%s642_s0 + $0x8] sm:$0xff]  ;;  %v241_v23 = vld [vmem:[%s646_s4 + $0x10] sm:$0xff]  ;;  %v56_v24 = vld [vmem:[%s644_s2 + $0x18] sm:$0xff] }
   0x9   :  { %v178_v21 = vsel %vm161_vm0, %v432_v20, 0  ;;  %v240_v22 = vld [vmem:[%s646_s4 + $0x8] sm:$0xff]  ;;  %v431_v25 = vld [vmem:[%s642_s0] sm:$0xff]  ;;  %78 = vperm.xlu2 %459, %v56_v24   ;;  %v55_v27 = vld [vmem:[%s644_s2 + $0x10] sm:$0xff] }
   0xa   :  { %v175_v26 = vsel %vm161_vm0, %v431_v25, 0  ;;  %v309_v28 = vld [vmem:[%s647_s5] sm:$0xff]  ;;  %v310_v29 = vld [vmem:[%s647_s5 + $0x8] sm:$0xff]  ;;  %v429_v30 = vld [vmem:[%s643_s1 + $0x10] sm:$0xff] }
   0xb   :  { %v427_v31 = vld [vmem:[%s643_s1] sm:$0xff]  ;;  %v428_v32 = vld [vmem:[%s643_s1 + $0x8] sm:$0xff]  ;;  %v312_v34 = vld [vmem:[%s647_s5 + $0x18] sm:$0xff] }
   0xc   :  { %v239_v33 = vld [vmem:[%s646_s4] sm:$0xff]  ;;  %v242_v36 = vld [vmem:[%s646_s4 + $0x18] sm:$0xff]  ;;  %v311_v38 = vld [vmem:[%s647_s5 + $0x10] sm:$0xff] }
   0xd   :  { %442 = vmatpush.bf16.xpose.msra.mxu3 %v193_v4  ;;  %199 = vmatpush.bf16.xpose.msra.mxu0 %v193_v4  ;;  %v346_v35 = vld [vmem:[#allocation2] sm:$0x1]  ;;  %v430_v37 = vld [vmem:[%s643_s1 + $0x18] sm:$0xff]  ;;  %v237_v9 = vld [vmem:[%s645_s3 + $0x10] sm:$0xff] }
   0xe   :  { %441 = vmatpush.bf16.xpose.msra.mxu2 %v193_v4  ;;  %v235_v7 = vld [vmem:[%s645_s3] sm:$0xff]  ;;  %v238_v10 = vld [vmem:[%s645_s3 + $0x18] sm:$0xff] }
   0xf   :  { %93 = vperm.xlu0 %457, %v59_v14  }
  0x10   :  { %83 = vperm.xlu1 %458, %v57_v15  }
  0x11   :  { %73 = vperm.xlu2 %459, %v55_v27  }
  0x15   :  { %444 = vmatpush.bf16.xpose.msra.mxu3 %v190_v6  ;;  %200 = vmatpush.bf16.xpose.msra.mxu0 %v190_v6 }
  0x16   :  { %443 = vmatpush.bf16.xpose.msra.mxu2 %v190_v6 }
  0x17   :  { %68 = vperm.xlu0 %457, %v54_v18  }
  0x18   :  { %63 = vperm.xlu1 %458, %v53_v19  }
  0x19   :  { %245 = vperm.xlu2 %459, %v239_v33  }
  0x1d   :  { %446 = vmatpush.bf16.xpose.msra.mxu3 %v187_v8  ;;  %201 = vmatpush.bf16.xpose.msra.mxu0 %v187_v8 }
  0x1e   :  { %445 = vmatpush.bf16.xpose.msra.mxu2 %v187_v8  ;;  %v236_v8 = vld [vmem:[%s645_s3 + $0x8] sm:$0xff]  ;;  %s487_s3 = smov [#allocation3]  }
  0x1f   :  { %250 = vperm.xlu0 %457, %v240_v22   ;;  %s360_s13 = sshll.u32 %s487_s3, 4  ;;  %s361_s13 = int_to_ptr.vmem [resolvable:$true] %s360_s13 }
  0x20   :  { %255 = vperm.xlu1 %458, %v241_v23  }
  0x21   :  { %260 = vperm.xlu2 %459, %v242_v36  }
  0x25   :  { %448 = vmatpush.bf16.xpose.msra.mxu3 %v184_v13  ;;  %202 = vmatpush.bf16.xpose.msra.mxu0 %v184_v13 }
  0x26   :  { %447 = vmatpush.bf16.xpose.msra.mxu2 %v184_v13 }
  0x27   :  { %315 = vperm.xlu0 %457, %v309_v28  }
  0x28   :  { %320 = vperm.xlu1 %458, %v310_v29  }
  0x29   :  { %325 = vperm.xlu2 %459, %v311_v38  }
  0x2d   :  { %450 = vmatpush.bf16.xpose.msra.mxu3 %v181_v17  ;;  %203 = vmatpush.bf16.xpose.msra.mxu0 %v181_v17 }
  0x2e   :  { %449 = vmatpush.bf16.xpose.msra.mxu2 %v181_v17 }
  0x2f   :  { %330 = vperm.xlu0 %457, %v312_v34  }
  0x30   :  { %349 = vperm.xlu1 %458, %v346_v35  }
  0x35   :  { %452 = vmatpush.bf16.xpose.msra.mxu3 %v178_v21  ;;  %204 = vmatpush.bf16.xpose.msra.mxu0 %v178_v21 }
  0x36   :  { %451 = vmatpush.bf16.xpose.msra.mxu2 %v178_v21 }
  0x3d   :  { %454 = vmatpush.bf16.xpose.msra.mxu3 %v175_v26  ;;  %205 = vmatpush.bf16.xpose.msra.mxu0 %v175_v26 }
  0x3e   :  { %453 = vmatpush.bf16.xpose.msra.mxu2 %v175_v26 }
  0x44   :  { %421 = vmatmul.msk.bf16.vlgmr.msra.gmra.mxu3 %vm161_vm0, %v429_v30  ;;  %419 = vmatmul.msk.bf16.vlgmr.msra.gmra.mxu0 %vm161_vm0, %v427_v31 }
  0x45   :  { %420 = vmatmul.msk.bf16.vlgmr.msra.gmra.mxu2 %vm161_vm0, %v428_v32 }
  0x54   :  { %422 = vmatmul.msk.bf16.gmra.mxu3 %vm161_vm0, %v430_v37 }
  0x63   :  { %v79_v45 = vpop.permute.xlu2 %78 }
  0x6b   :  { %v74_v59 = vpop.permute.xlu2 %73 }
  0x73   :  { %v246_v12 = vpop.permute.xlu2 %245 }
  0x79   :  { %v99_v41 = vpop.permute.xlu0 %98 }
  0x7a   :  { %v89_v42 = vpop.permute.xlu1 %88 }
  0x7b   :  { %v261_v16 = vpop.permute.xlu2 %260 }
  0x81   :  { %v94_v47 = vpop.permute.xlu0 %93 }
  0x82   :  { %v84_v51 = vpop.permute.xlu1 %83 }
  0x83   :  { %v326_v27 = vpop.permute.xlu2 %325 }
  0x89   :  { %v69_v63 = vpop.permute.xlu0 %68 }
  0x8a   :  { %v64_v2 = vpop.permute.xlu1 %63 }
  0x91   :  { %v251_v13 = vpop.permute.xlu0 %250 }
  0x92   :  { %v256_v15 = vpop.permute.xlu1 %255 }
  0x99   :  { %v316_v21 = vpop.permute.xlu0 %315 }
  0x9a   :  { %v321_v25 = vpop.permute.xlu1 %320 }
  0xa1   :  { %v331_v34 = vpop.permute.xlu0 %330 }
  0xc1   :  { %v207_v46 = vpop.f32.mrf.mxu0 }
  0xc2   :  { %v208_v3 = vadd.f32 %v207_v46, %v64_v2 }
  0xc4   :  { %v227_v6 = vmax.f32 %v208_v3, 0.0 }
  0xc7   :  { %v217_v39 = vpop.f32.mrf.mxu3 }
  0xc8   :  { %v212_v44 = vpop.f32.mrf.mxu2  ;;  %v218_v55 = vadd.f32 %v217_v39, %v84_v51 }
  0xc9   :  { %v209_v60 = vpop.f32.mrf.mxu0  ;;  %v213_v62 = vadd.f32 %v212_v44, %v74_v59 }
  0xca   :  { %v231_v61 = vmax.f32 %v218_v55, 0.0  ;;  %v210_v0 = vadd.f32 %v209_v60, %v69_v63 }
  0xcb   :  { %v229_v4 = vmax.f32 %v213_v62, 0.0 }
  0xcc   :  { %v228_v5 = vmax.f32 %v210_v0, 0.0 }
  0xcf   :  { %v219_v40 = vpop.f32.mrf.mxu3 }
  0xd0   :  { %v220_v52 = vadd.f32 %v219_v40, %v89_v42  ;;  %v214_v54 = vpop.f32.mrf.mxu2  ;;  %v350_v42 = vpop.permute.xlu1 %349 }
  0xd1   :  { %v215_v58 = vadd.f32 %v214_v54, %v79_v45  ;;  %v352_v44 = vperm.slane %v350_v42, 0 }
  0xd2   :  { %v232_v57 = vmax.f32 %v220_v52, 0.0 }
  0xd3   :  { %v230_v1 = vmax.f32 %v215_v58, 0.0 }
  0xd7   :  { %v222_v43 = vpop.f32.mrf.mxu3 }
  0xd8   :  { %v223_v49 = vadd.f32 %v222_v43, %v94_v47 }
  0xda   :  { %v233_v56 = vmax.f32 %v223_v49, 0.0 }
  0xdf   :  { %v224_v48 = vpop.f32.mrf.mxu3 }
  0xe0   :  { %v225_v50 = vadd.f32 %v224_v48, %v99_v41 }
  0xe2   :  { %v234_v53 = vmax.f32 %v225_v50, 0.0 }
  0xe4   :  { %284 = vmatpush.msra.mxu1 %v234_v53 }
  0xe6   :  { %285 = vmatpush.msra.mxu1 %v233_v56 }
  0xe8   :  { %286 = vmatpush.msra.mxu1 %v232_v57 }
  0xea   :  { %287 = vmatpush.msra.mxu1 %v231_v61 }
  0xec   :  { %288 = vmatpush.msra.mxu1 %v230_v1 }
  0xee   :  { %289 = vmatpush.msra.mxu1 %v229_v4 }
  0xf0   :  { %290 = vmatpush.msra.mxu1 %v228_v5 }
  0xf2   :  { %291 = vmatpush.msra.mxu1 %v227_v6 }
  0xf3   :  { %423 = vmatmul.msk.f32.vlgmr.msra.gmra.mxu1 %vm263_vm1, %v235_v7 }
  0xfb   :  { %424 = vmatmul.msk.f32.gmra.mxu1 %vm263_vm1, %v236_v8 }
 0x103   :  { %425 = vmatmul.msk.f32.gmra.mxu1 %vm263_vm1, %v237_v9 }
 0x10b   :  { %426 = vmatmul.msk.f32.gmra.mxu1 %vm263_vm1, %v238_v10 }
 0x170   :  { %v293_v11 = vpop.f32.mrf.mxu1 }
 0x171   :  { %v294_v19 = vadd.f32 %v293_v11, %v246_v12 }
 0x173   :  { %v305_v23 = vmax.f32 %v294_v19, 0.0 }
 0x175   :  { %v333_v29 = vmul.f32 %v316_v21, %v305_v23 }
 0x178   :  { %v296_v14 = vpop.f32.mrf.mxu1 }
 0x179   :  { %v297_v17 = vadd.f32 %v296_v14, %v251_v13 }
 0x17b   :  { %v306_v22 = vmax.f32 %v297_v17, 0.0 }
 0x17d   :  { %v334_v26 = vmul.f32 %v321_v25, %v306_v22 }
 0x17f   :  { %v337_v32 = vadd.f32 %v334_v26, %v333_v29 }
 0x180   :  { %v299_v18 = vpop.f32.mrf.mxu1 }
 0x181   :  { %v300_v20 = vadd.f32 %v299_v18, %v256_v15 }
 0x183   :  { %v307_v24 = vmax.f32 %v300_v20, 0.0 }
 0x185   :  { %v335_v30 = vmul.f32 %v326_v27, %v307_v24 }
 0x187   :  { %v338_v35 = vadd.f32 %v337_v32, %v335_v30 }
 0x188   :  { %v302_v28 = vpop.f32.mrf.mxu1 }
 0x189   :  { %v303_v31 = vadd.f32 %v302_v28, %v261_v16 }
 0x18b   :  { %v308_v33 = vmax.f32 %v303_v31, 0.0 }
 0x18d   :  { %v336_v36 = vmul.f32 %v331_v34, %v308_v33 }
 0x18f   :  { %v339_v37 = vadd.f32 %v338_v35, %v336_v36 }
 0x191   :  { %v340_v38 = vrot.slane %v339_v37, 4 }
 0x193   :  { %v341_v39 = vadd.f32 %v340_v38, %v339_v37 }
 0x195   :  { %v342_v40 = vrot.slane %v341_v39, 2 }
 0x197   :  { %v343_v41 = vadd.f32 %v342_v40, %v341_v39 }
 0x199   :  { %v344_v43 = vrot.slane %v343_v41, 1 }
 0x19b   :  { %v345_v45 = vadd.f32 %v344_v43, %v343_v41 }
 0x19d   :  { %v353_v46 = vadd.f32 %v352_v44, %v345_v45 }
 0x19f   :  { %354 = vst [vmem:[#allocation3] sm:$0x1] %v353_v46 }
 0x1a0   :  { %365 = dma.vmem_to_hbm [thread:$0]  %s361_s13, 16, %s363_s16, [#allocation4]  }
 0x1a1   :  { %484 = dma.done.wait [#allocation4], 16  }
 0x1a2   :  { %485 = vsyncadd [#allocation4], 4294967280 }
 0x1a3   :  { %370 = vsyncpa [#allocation4], 1 }

</bundles_post_ra>
